<compile_context>
chip_gen: v5e
topology: v5e:2x2
jax: 0.10.0
libtpu: 0.0.40
codegen_flags: <defaults>
</compile_context>

<pallas_src>
import numpy as np

import jax
import jax.numpy as jnp
from jax.experimental import pallas as pl
from jax.experimental.pallas import tpu as pltpu

# ----------------------------- configuration --------------------------------
# BaseConvBlock(in_channels=4, out_channels=8, kernel_size=(3,3), stride=(1,1),
#               padding=1, max_pool=True, kernel_max_pool=2, stride_max_pool=2)
N, C_IN, H, W = 2, 4, 16, 16
C_OUT = 8
KH, KW = 3, 3
STRIDE = 1
PAD = 1
POOL_K, POOL_S = 2, 2
EPS = 1e-5

HO, WO = H, W                              # conv output spatial (k=3, s=1, p=1)
HP, WP = HO // POOL_S, WO // POOL_S        # pooled spatial (8, 8)
Q = N * HP * WP                            # valid pooled positions / channel (=128)
HPAD, WPAD = H + 2 * PAD, W + 2 * PAD      # 18, 18
SPAT = N * HPAD * WPAD                     # 648 flat padded positions
NPY = ((SPAT + 127) // 128) * 128          # 768: conv/pool/BN compute & output width
MAX_OFF = (KH - 1) * WPAD + (KW - 1)       # 38: largest im2col lane shift
NPX = ((NPY + MAX_OFF + 127) // 128) * 128  # 896: input slab lane width

# Mask of the Q valid pooled columns inside the flat (n, h_pad, w_pad) layout
# (static config -> built once on host, passed as a tiny (1, 768) operand).
_mask = np.zeros((1, NPY), np.float32)
for _n in range(N):
    for _ph in range(HP):
        for _pw in range(WP):
            _mask[0, _n * HPAD * WPAD + (POOL_S * _ph) * WPAD + POOL_S * _pw] = 1.0
POOL_MASK = jnp.asarray(_mask)


# ------------------------------- kernel -------------------------------------
def conv_block_kernel(x_ref, w_ref, p_ref, mask_ref, out_ref):
    # x_ref    : (C_IN, NPX)      zero-padded input, flat (n, h_pad, w_pad) on lanes
    # w_ref    : (KH*KW, C_OUT, C_IN)  one (C_OUT, C_IN) weight tap per (kh, kw)
    # p_ref    : (C_OUT, 3)       columns = [gamma, beta, conv_bias]
    # mask_ref : (1, NPY)         1.0 at valid pooled positions, else 0.0
    # out_ref  : (C_OUT, NPY)     full lane-dense slab (wrapper extracts valid grid)

    # ---- Conv2d(3x3): in-kernel im2col as 9 shifted, accumulated MXU matmuls.
    # y[co, p] = sum_{kh,kw,ci} W[kh,kw,co,ci] * x[ci, p + kh*WPAD + kw]
    # Valid conv positions never read past the real data; garbage columns are
    # masked out of the BN statistics and discarded by the wrapper.
    y = None
    for kh in range(KH):
        for kw in range(KW):
            tap = kh * KW + kw
            off = kh * WPAD + kw
            part = jnp.dot(w_ref[tap], x_ref[:, off:off + NPY],
                           preferred_element_type=jnp.float32)    # (C_OUT, NPY)
            y = part if y is None else y + part
    y = y + p_ref[:, 2:3]                                          # conv bias

    # ---- MaxPool2d(2,2): two XLU lane rotations + maxima.
    # m2[p] = max(y[p], y[p+1], y[p+WPAD], y[p+WPAD+1]); valid pooled outputs live
    # at p = n*HPAD*WPAD + 2*ph*WPAD + 2*pw (wrap-around only hits masked columns).
    m1 = jnp.maximum(y, pltpu.roll(y, shift=NPY - 1, axis=1))
    m2 = jnp.maximum(m1, pltpu.roll(m1, shift=NPY - WPAD, axis=1))

    # ---- BatchNorm2d (training-mode batch stats over the Q valid positions).
    # Centered two-pass variance for numerical robustness.
    # TODO(synk): running_mean / running_var buffer updates (PyTorch train-mode
    # side effect) are not modeled; only the functional forward output is produced.
    mask = mask_ref[...]                                           # (1, NPY)
    inv_q = 1.0 / Q
    mean = jnp.sum(m2 * mask, axis=1, keepdims=True) * inv_q       # (C_OUT, 1)
    cent = (m2 - mean) * mask
    var = jnp.sum(cent * cent, axis=1, keepdims=True) * inv_q      # biased, like BN

    gamma = p_ref[:, 0:1]
    beta = p_ref[:, 1:2]
    scale = gamma * jax.lax.rsqrt(var + EPS)                       # (C_OUT, 1)
    bn_shift = beta - mean * scale                                 # (C_OUT, 1)

    # ---- affine + ReLU: full-width (8, 768) unmasked lane-dense store.
    out_ref[...] = jnp.maximum(m2 * scale + bn_shift, 0.0)


# ------------------------------- wrapper -------------------------------------
@jax.jit
def base_conv_block_forward(x_nchw, weight, bias, gamma, beta):
    """x_nchw: (N, C_IN, H, W) f32 -> (N, C_OUT, HP, WP) f32 (NCHW, like PyTorch)."""
    # Zero-pad and lay the input out lane-dense as (C_IN, n*HPAD*WPAD), then pad
    # lanes to NPX so every shifted conv-window read stays in bounds.  This is
    # ~14 KiB of pure layout plumbing (vs. the old 72 KiB im2col slab).
    xp = jnp.pad(x_nchw, ((0, 0), (0, 0), (PAD, PAD), (PAD, PAD)))        # (N,C,18,18)
    xs = jnp.transpose(xp, (1, 0, 2, 3)).reshape(C_IN, SPAT)              # (4, 648)
    x_slab = jnp.pad(xs, ((0, 0), (0, NPX - SPAT))).astype(jnp.float32)   # (4, 896)

    # Weight (C_OUT, C_IN, KH, KW) -> one (C_OUT, C_IN) tap per (kh, kw).
    w_taps = jnp.transpose(weight, (2, 3, 0, 1)).reshape(KH * KW, C_OUT, C_IN)
    w_taps = w_taps.astype(jnp.float32)                                   # (9, 8, 4)

    # gamma / beta / conv-bias packed into one tiny operand (single DMA).
    params = jnp.stack([gamma, beta, bias], axis=1).astype(jnp.float32)   # (8, 3)

    out_slab = pl.pallas_call(
        conv_block_kernel,
        out_shape=jax.ShapeDtypeStruct((C_OUT, NPY), jnp.float32),
        in_specs=[pl.BlockSpec(memory_space=pltpu.MemorySpace.VMEM)] * 4,
        out_specs=pl.BlockSpec(memory_space=pltpu.MemorySpace.VMEM),
    )(x_slab, w_taps, params, POOL_MASK)

    # Pure layout: extract the stride-2 valid pooled grid from the flat slab.
    out = out_slab[:, :SPAT].reshape(C_OUT, N, HPAD, WPAD)
    out = out[:, :, 0:HO:POOL_S, 0:WO:POOL_S]                             # (8,2,8,8)
    return jnp.transpose(out, (1, 0, 2, 3))                               # (2,8,8,8)


# --------------------------- pure-JAX reference ------------------------------
def reference_forward(x_nchw, weight, bias, gamma, beta):
    conv = jax.lax.conv_general_dilated(
        x_nchw, weight, window_strides=(STRIDE, STRIDE),
        padding=((PAD, PAD), (PAD, PAD)),
        dimension_numbers=("NCHW", "OIHW", "NCHW"))
    conv = conv + bias[None, :, None, None]
    pooled = jax.lax.reduce_window(
        conv, -jnp.inf, jax.lax.max,
        (1, 1, POOL_K, POOL_K), (1, 1, POOL_S, POOL_S), "VALID")
    mean = pooled.mean(axis=(0, 2, 3), keepdims=True)
    var = jnp.square(pooled - mean).mean(axis=(0, 2, 3), keepdims=True)
    y = (pooled - mean) * jax.lax.rsqrt(var + EPS)
    y = y * gamma[None, :, None, None] + beta[None, :, None, None]
    return jnp.maximum(y, 0.0)


# --------------------------------- main --------------------------------------
if __name__ == "__main__":
    key = jax.random.PRNGKey(0)
    kx, kw_, kb = jax.random.split(key, 3)

    x = jax.random.normal(kx, (N, C_IN, H, W), dtype=jnp.float32)

    # Deterministic parameter init mirroring the module's __init__:
    # conv weight: kaiming_normal_ (std = sqrt(2 / fan_in), fan_in = C_IN*KH*KW)
    fan_in = C_IN * KH * KW
    weight = jax.random.normal(kw_, (C_OUT, C_IN, KH, KW), jnp.float32) * jnp.sqrt(2.0 / fan_in)
    # conv bias: default uniform(-1/sqrt(fan_in), 1/sqrt(fan_in))
    bound = 1.0 / jnp.sqrt(jnp.float32(fan_in))
    bias = jax.random.uniform(kb, (C_OUT,), jnp.float32, -bound, bound)
    # batch-norm affine params at init
    gamma = jnp.ones((C_OUT,), jnp.float32)
    beta = jnp.zeros((C_OUT,), jnp.float32)

    out = base_conv_block_forward(x, weight, bias, gamma, beta)
    out = jax.block_until_ready(out)

    ref = reference_forward(x, weight, bias, gamma, beta)
    assert out.shape == (N, C_OUT, HP, WP), out.shape
    # Tolerance leaves headroom for default (bf16-pass) MXU/conv precision on
    # either side; both paths accumulate in f32.
    assert jnp.allclose(out, ref, atol=2e-2, rtol=2e-2), \
        f"max abs err {jnp.max(jnp.abs(out - ref))}"

    print("KERNEL_OK")
</pallas_src>

<mosaic_0001>
module attributes {stable_mosaic.version = 11 : i64} {
  func.func @conv_block_kernel(%arg0: memref<4x896xf32, #tpu.memory_space<vmem>>, %arg1: memref<9x8x4xf32, #tpu.memory_space<vmem>>, %arg2: memref<8x3xf32, #tpu.memory_space<vmem>>, %arg3: memref<1x768xf32, #tpu.memory_space<vmem>>, %arg4: memref<8x768xf32, #tpu.memory_space<vmem>>) attributes {dimension_semantics = [], scalar_prefetch = 0 : i64, scratch_operands = 0 : i64, tpu.core_type = #tpu.core_type<tc>} {
    %c0 = arith.constant 0 : index
    %c0_0 = arith.constant 0 : index
    %c0_1 = arith.constant 0 : index
    %0 = vector.load %arg1[%c0, %c0_0, %c0_1] : memref<9x8x4xf32, #tpu.memory_space<vmem>>, vector<1x8x4xf32>
    %1 = vector.shape_cast %0 : vector<1x8x4xf32> to vector<8x4xf32>
    %c0_2 = arith.constant 0 : index
    %c0_3 = arith.constant 0 : index
    %2 = vector.load %arg0[%c0_2, %c0_3] : memref<4x896xf32, #tpu.memory_space<vmem>>, vector<4x768xf32>
    %cst = arith.constant dense<0.000000e+00> : vector<8x768xf32>
    %3 = tpu.matmul %1, %2, %cst {dimension_numbers = #tpu.dot_dimension_numbers<[1], [0], [0], [1], [0, 0, 1, 1], [], []>} : vector<8x4xf32>, vector<4x768xf32>, vector<8x768xf32> -> vector<8x768xf32>
    %c1 = arith.constant 1 : index
    %c0_4 = arith.constant 0 : index
    %c0_5 = arith.constant 0 : index
    %4 = vector.load %arg1[%c1, %c0_4, %c0_5] : memref<9x8x4xf32, #tpu.memory_space<vmem>>, vector<1x8x4xf32>
    %5 = vector.shape_cast %4 : vector<1x8x4xf32> to vector<8x4xf32>
    %c0_6 = arith.constant 0 : index
    %c1_7 = arith.constant 1 : index
    %6 = vector.load %arg0[%c0_6, %c1_7] : memref<4x896xf32, #tpu.memory_space<vmem>>, vector<4x768xf32>
    %cst_8 = arith.constant dense<0.000000e+00> : vector<8x768xf32>
    %7 = tpu.matmul %5, %6, %cst_8 {dimension_numbers = #tpu.dot_dimension_numbers<[1], [0], [0], [1], [0, 0, 1, 1], [], []>} : vector<8x4xf32>, vector<4x768xf32>, vector<8x768xf32> -> vector<8x768xf32>
    %8 = arith.addf %3, %7 : vector<8x768xf32>
    %c2 = arith.constant 2 : index
    %c0_9 = arith.constant 0 : index
    %c0_10 = arith.constant 0 : index
    %9 = vector.load %arg1[%c2, %c0_9, %c0_10] : memref<9x8x4xf32, #tpu.memory_space<vmem>>, vector<1x8x4xf32>
    %10 = vector.shape_cast %9 : vector<1x8x4xf32> to vector<8x4xf32>
    %c0_11 = arith.constant 0 : index
    %c2_12 = arith.constant 2 : index
    %11 = vector.load %arg0[%c0_11, %c2_12] : memref<4x896xf32, #tpu.memory_space<vmem>>, vector<4x768xf32>
    %cst_13 = arith.constant dense<0.000000e+00> : vector<8x768xf32>
    %12 = tpu.matmul %10, %11, %cst_13 {dimension_numbers = #tpu.dot_dimension_numbers<[1], [0], [0], [1], [0, 0, 1, 1], [], []>} : vector<8x4xf32>, vector<4x768xf32>, vector<8x768xf32> -> vector<8x768xf32>
    %13 = arith.addf %8, %12 : vector<8x768xf32>
    %c3 = arith.constant 3 : index
    %c0_14 = arith.constant 0 : index
    %c0_15 = arith.constant 0 : index
    %14 = vector.load %arg1[%c3, %c0_14, %c0_15] : memref<9x8x4xf32, #tpu.memory_space<vmem>>, vector<1x8x4xf32>
    %15 = vector.shape_cast %14 : vector<1x8x4xf32> to vector<8x4xf32>
    %c0_16 = arith.constant 0 : index
    %c18 = arith.constant 18 : index
    %16 = vector.load %arg0[%c0_16, %c18] : memref<4x896xf32, #tpu.memory_space<vmem>>, vector<4x768xf32>
    %cst_17 = arith.constant dense<0.000000e+00> : vector<8x768xf32>
    %17 = tpu.matmul %15, %16, %cst_17 {dimension_numbers = #tpu.dot_dimension_numbers<[1], [0], [0], [1], [0, 0, 1, 1], [], []>} : vector<8x4xf32>, vector<4x768xf32>, vector<8x768xf32> -> vector<8x768xf32>
    %18 = arith.addf %13, %17 : vector<8x768xf32>
    %c4 = arith.constant 4 : index
    %c0_18 = arith.constant 0 : index
    %c0_19 = arith.constant 0 : index
    %19 = vector.load %arg1[%c4, %c0_18, %c0_19] : memref<9x8x4xf32, #tpu.memory_space<vmem>>, vector<1x8x4xf32>
    %20 = vector.shape_cast %19 : vector<1x8x4xf32> to vector<8x4xf32>
    %c0_20 = arith.constant 0 : index
    %c19 = arith.constant 19 : index
    %21 = vector.load %arg0[%c0_20, %c19] : memref<4x896xf32, #tpu.memory_space<vmem>>, vector<4x768xf32>
    %cst_21 = arith.constant dense<0.000000e+00> : vector<8x768xf32>
    %22 = tpu.matmul %20, %21, %cst_21 {dimension_numbers = #tpu.dot_dimension_numbers<[1], [0], [0], [1], [0, 0, 1, 1], [], []>} : vector<8x4xf32>, vector<4x768xf32>, vector<8x768xf32> -> vector<8x768xf32>
    %23 = arith.addf %18, %22 : vector<8x768xf32>
    %c5 = arith.constant 5 : index
    %c0_22 = arith.constant 0 : index
    %c0_23 = arith.constant 0 : index
    %24 = vector.load %arg1[%c5, %c0_22, %c0_23] : memref<9x8x4xf32, #tpu.memory_space<vmem>>, vector<1x8x4xf32>
    %25 = vector.shape_cast %24 : vector<1x8x4xf32> to vector<8x4xf32>
    %c0_24 = arith.constant 0 : index
    %c20 = arith.constant 20 : index
    %26 = vector.load %arg0[%c0_24, %c20] : memref<4x896xf32, #tpu.memory_space<vmem>>, vector<4x768xf32>
    %cst_25 = arith.constant dense<0.000000e+00> : vector<8x768xf32>
    %27 = tpu.matmul %25, %26, %cst_25 {dimension_numbers = #tpu.dot_dimension_numbers<[1], [0], [0], [1], [0, 0, 1, 1], [], []>} : vector<8x4xf32>, vector<4x768xf32>, vector<8x768xf32> -> vector<8x768xf32>
    %28 = arith.addf %23, %27 : vector<8x768xf32>
    %c6 = arith.constant 6 : index
    %c0_26 = arith.constant 0 : index
    %c0_27 = arith.constant 0 : index
    %29 = vector.load %arg1[%c6, %c0_26, %c0_27] : memref<9x8x4xf32, #tpu.memory_space<vmem>>, vector<1x8x4xf32>
    %30 = vector.shape_cast %29 : vector<1x8x4xf32> to vector<8x4xf32>
    %c0_28 = arith.constant 0 : index
    %c36 = arith.constant 36 : index
    %31 = vector.load %arg0[%c0_28, %c36] : memref<4x896xf32, #tpu.memory_space<vmem>>, vector<4x768xf32>
    %cst_29 = arith.constant dense<0.000000e+00> : vector<8x768xf32>
    %32 = tpu.matmul %30, %31, %cst_29 {dimension_numbers = #tpu.dot_dimension_numbers<[1], [0], [0], [1], [0, 0, 1, 1], [], []>} : vector<8x4xf32>, vector<4x768xf32>, vector<8x768xf32> -> vector<8x768xf32>
    %33 = arith.addf %28, %32 : vector<8x768xf32>
    %c7 = arith.constant 7 : index
    %c0_30 = arith.constant 0 : index
    %c0_31 = arith.constant 0 : index
    %34 = vector.load %arg1[%c7, %c0_30, %c0_31] : memref<9x8x4xf32, #tpu.memory_space<vmem>>, vector<1x8x4xf32>
    %35 = vector.shape_cast %34 : vector<1x8x4xf32> to vector<8x4xf32>
    %c0_32 = arith.constant 0 : index
    %c37 = arith.constant 37 : index
    %36 = vector.load %arg0[%c0_32, %c37] : memref<4x896xf32, #tpu.memory_space<vmem>>, vector<4x768xf32>
    %cst_33 = arith.constant dense<0.000000e+00> : vector<8x768xf32>
    %37 = tpu.matmul %35, %36, %cst_33 {dimension_numbers = #tpu.dot_dimension_numbers<[1], [0], [0], [1], [0, 0, 1, 1], [], []>} : vector<8x4xf32>, vector<4x768xf32>, vector<8x768xf32> -> vector<8x768xf32>
    %38 = arith.addf %33, %37 : vector<8x768xf32>
    %c8 = arith.constant 8 : index
    %c0_34 = arith.constant 0 : index
    %c0_35 = arith.constant 0 : index
    %39 = vector.load %arg1[%c8, %c0_34, %c0_35] : memref<9x8x4xf32, #tpu.memory_space<vmem>>, vector<1x8x4xf32>
    %40 = vector.shape_cast %39 : vector<1x8x4xf32> to vector<8x4xf32>
    %c0_36 = arith.constant 0 : index
    %c38 = arith.constant 38 : index
    %41 = vector.load %arg0[%c0_36, %c38] : memref<4x896xf32, #tpu.memory_space<vmem>>, vector<4x768xf32>
    %cst_37 = arith.constant dense<0.000000e+00> : vector<8x768xf32>
    %42 = tpu.matmul %40, %41, %cst_37 {dimension_numbers = #tpu.dot_dimension_numbers<[1], [0], [0], [1], [0, 0, 1, 1], [], []>} : vector<8x4xf32>, vector<4x768xf32>, vector<8x768xf32> -> vector<8x768xf32>
    %43 = arith.addf %38, %42 : vector<8x768xf32>
    %c0_38 = arith.constant 0 : index
    %c2_39 = arith.constant 2 : index
    %44 = vector.load %arg2[%c0_38, %c2_39] : memref<8x3xf32, #tpu.memory_space<vmem>>, vector<8x1xf32>
    %45 = vector.broadcast %44 : vector<8x1xf32> to vector<8x768xf32>
    %46 = arith.addf %43, %45 : vector<8x768xf32>
    %c767_i32 = arith.constant 767 : i32
    %47 = tpu.dynamic_rotate %46 by %c767_i32 dim 1 : vector<8x768xf32>, i32 -> vector<8x768xf32>
    %48 = arith.maximumf %46, %47 : vector<8x768xf32>
    %c750_i32 = arith.constant 750 : i32
    %49 = tpu.dynamic_rotate %48 by %c750_i32 dim 1 : vector<8x768xf32>, i32 -> vector<8x768xf32>
    %50 = arith.maximumf %48, %49 : vector<8x768xf32>
    %c0_40 = arith.constant 0 : index
    %c0_41 = arith.constant 0 : index
    %51 = vector.load %arg3[%c0_40, %c0_41] : memref<1x768xf32, #tpu.memory_space<vmem>>, vector<1x768xf32>
    %52 = vector.broadcast %51 : vector<1x768xf32> to vector<8x768xf32>
    %53 = arith.mulf %50, %52 : vector<8x768xf32>
    %cst_42 = arith.constant dense<0.000000e+00> : vector<8xf32>
    %54 = vector.multi_reduction <add>, %53, %cst_42 [1] : vector<8x768xf32> to vector<8xf32>
    %55 = vector.shape_cast %54 : vector<8xf32> to vector<8x1xf32>
    %cst_43 = arith.constant 7.812500e-03 : f32
    %56 = vector.broadcast %cst_43 : f32 to vector<8x1xf32>
    %57 = arith.mulf %55, %56 : vector<8x1xf32>
    %58 = vector.broadcast %57 : vector<8x1xf32> to vector<8x768xf32>
    %59 = arith.subf %50, %58 : vector<8x768xf32>
    %60 = vector.broadcast %51 : vector<1x768xf32> to vector<8x768xf32>
    %61 = arith.mulf %59, %60 : vector<8x768xf32>
    %62 = arith.mulf %61, %61 : vector<8x768xf32>
    %cst_44 = arith.constant dense<0.000000e+00> : vector<8xf32>
    %63 = vector.multi_reduction <add>, %62, %cst_44 [1] : vector<8x768xf32> to vector<8xf32>
    %64 = vector.shape_cast %63 : vector<8xf32> to vector<8x1xf32>
    %cst_45 = arith.constant 7.812500e-03 : f32
    %65 = vector.broadcast %cst_45 : f32 to vector<8x1xf32>
    %66 = arith.mulf %64, %65 : vector<8x1xf32>
    %c0_46 = arith.constant 0 : index
    %c0_47 = arith.constant 0 : index
    %67 = vector.load %arg2[%c0_46, %c0_47] : memref<8x3xf32, #tpu.memory_space<vmem>>, vector<8x1xf32>
    %c0_48 = arith.constant 0 : index
    %c1_49 = arith.constant 1 : index
    %68 = vector.load %arg2[%c0_48, %c1_49] : memref<8x3xf32, #tpu.memory_space<vmem>>, vector<8x1xf32>
    %cst_50 = arith.constant 9.99999974E-6 : f32
    %69 = vector.broadcast %cst_50 : f32 to vector<8x1xf32>
    %70 = arith.addf %66, %69 : vector<8x1xf32>
    %71 = math.rsqrt %70 : vector<8x1xf32>
    %72 = arith.mulf %67, %71 : vector<8x1xf32>
    %73 = arith.mulf %57, %72 : vector<8x1xf32>
    %74 = arith.subf %68, %73 : vector<8x1xf32>
    %75 = vector.broadcast %72 : vector<8x1xf32> to vector<8x768xf32>
    %76 = arith.mulf %50, %75 : vector<8x768xf32>
    %77 = vector.broadcast %74 : vector<8x1xf32> to vector<8x768xf32>
    %78 = arith.addf %76, %77 : vector<8x768xf32>
    %cst_51 = arith.constant 0.000000e+00 : f32
    %79 = vector.broadcast %cst_51 : f32 to vector<8x768xf32>
    %80 = arith.maximumf %78, %79 : vector<8x768xf32>
    %c0_52 = arith.constant 0 : index
    %c0_53 = arith.constant 0 : index
    %81 = vector.load %arg4[%c0_52, %c0_53] : memref<8x768xf32, #tpu.memory_space<vmem>>, vector<8x768xf32>
    tpu.vector_store %arg4[%c0_52, %c0_53], %80 {strides = array<i32>} : memref<8x768xf32, #tpu.memory_space<vmem>>, vector<8x768xf32>,
    return
  }
}

</mosaic_0001>

<bundles_post_ra>
// kernel: base_conv_block_forward.1
= control target key start
LH: loop header
LB: loop body
LE: loop exit
PB: predicated region body
PF: predicated region fallthrough
CT: control target
= control target key end

     0   :  { %s1962_s25 = smov 127   ;;  %s1963_s26 = smov 126   ;;  %vm70_vm0 = vcmask 1043456   ;;  %vm59_vm1 = vcmask 1039360   ;;  %vm66_vm2 = vcmask 31744   ;;  %vm390_vm3 = vcmask 1031168   ;;  %s2402_s0 = inlined_call_operand.vmem [shape: f32[4,896], index: 0, kind: input, shape index: {}]   ;;  %s2403_s1 = inlined_call_operand.vmem [shape: f32[9,8,4], index: 1, kind: input, shape index: {}]   ;;  %s2404_s2 = inlined_call_operand.vmem [shape: f32[8,3], index: 2, kind: input, shape index: {}]   ;;  %s2405_s3 = inlined_call_operand.vmem [shape: f32[1,768], index: 3, kind: input, shape index: {}]   ;;  %s2406_s4 = inlined_call_operand.vmem [shape: f32[8,768], index: 4, kind: output, shape index: {}]  }
   0x1   :  { %v2002_v0 = vld [vmem:[%s2402_s0 + $0x8] sm:$0xff]  ;;  %v2007_v1 = vld [vmem:[%s2402_s0] sm:$0xff]  ;;  %v2012_v2 = vld [vmem:[%s2402_s0 + $0x10] sm:$0xff]  ;;  %s1964_s5 = smov 110   ;;  %s1965_s10 = smov 109   ;;  %vm576_vm4 = vcmask 900096  }
   0x2   :  { %33 = vst [vmem:[#allocation1 + $0x10] ss:$2 sm:$0xff] %v2002_v0  ;;  %v26_v3 = vld [vmem:[%s2402_s0 + $0x18] sm:$0xf]  ;;  %s1966_s13 = smov 108   ;;  %s1967_s14 = smov 92  }
   0x3   :  { %31 = vst [vmem:[#allocation1] ss:$2 sm:$0xff] %v2007_v1  ;;  %v357_v4 = vld [vmem:[%s2402_s0 + $0x18] sm:$0xf]  ;;  %s1968_s17 = smov 91   ;;  %s1969_s19 = smov 90  }
   0x4   :  { %35 = vst [vmem:[#allocation1 + $0x20] ss:$2 sm:$0xff] %v2012_v2  ;;  %v543_v28 = vld [vmem:[%s2402_s0 + $0x18] sm:$0xf]  ;;  %vm762_vm5 = vcmask 891904   ;;  %vm948_vm6 = vcmask 883712  }
   0x5   :  { %37 = vst [vmem:[#allocation1 + $0x30] ss:$2 sm:$0xff] %v26_v3  ;;  %v729_v33 = vld [vmem:[%s2402_s0 + $0x18] sm:$0xf]  ;;  %vm1134_vm7 = vcmask 752640   ;;  %vm1320_vm8 = vcmask 744448  }
   0x6   :  { %v915_v44 = vld [vmem:[%s2402_s0 + $0x18] sm:$0xf]  ;;  %vm1506_vm9 = vcmask 736256  }
   0x7   :  { %v1101_v46 = vld [vmem:[%s2402_s0 + $0x18] sm:$0xf] }
   0x8   :  { %v1287_v52 = vld [vmem:[%s2402_s0 + $0x18] sm:$0xf] }
   0x9   :  { %v40_v5 = vld.sshfl [vmem:[#allocation1 + $0x10] sm:$0xff pattern:$0x75316420]  ;;  %v41_v6 = vld.sshfl [vmem:[#allocation1 + $0x18] sm:$0xff pattern:$0x75316420] }
   0xa   :  { %49 = vrot.lane.b32.xlu1 %v40_v5, %s1962_s25  ;;  %v38_v7 = vld.sshfl [vmem:[#allocation1] sm:$0xff pattern:$0x75316420]  ;;  %208 = vst [vmem:[#allocation1 + $0x10] ss:$2 sm:$0xff] %v2002_v0 }
   0xb   :  { %45 = vrot.lane.b32.xlu0 %v38_v7, %s1962_s25  ;;  %v39_v8 = vld.sshfl [vmem:[#allocation1 + $0x8] sm:$0xff pattern:$0x75316420]  ;;  %v42_v9 = vld.sshfl [vmem:[#allocation1 + $0x20] sm:$0xff pattern:$0x75316420] }
   0xc   :  { %206 = vst [vmem:[#allocation1] ss:$2 sm:$0xff] %v2007_v1  ;;  %53 = vrot.lane.b32.xlu2 %v42_v9, %s1962_s25  ;;  %v44_v10 = vld.sshfl [vmem:[#allocation1 + $0x30] sm:$0xff pattern:$0x75316420] }
   0xd   :  { %368 = vst [vmem:[#allocation1 + $0x30] ss:$2 sm:$0xff] %v357_v4  ;;  %v43_v11 = vld.sshfl [vmem:[#allocation1 + $0x28] sm:$0xff pattern:$0x75316420] }
   0xe   :  { %210 = vst [vmem:[#allocation1 + $0x20] ss:$2 sm:$0xff] %v2012_v2  ;;  %v1473_v5 = vld [vmem:[%s2402_s0 + $0x18] sm:$0xf] }
  0x11   :  { %v2029_v12 = vld.sshfl [vmem:[#allocation1 + $0x10] sm:$0xff pattern:$0x75316420]  ;;  %v2031_v13 = vld.sshfl [vmem:[#allocation1 + $0x18] sm:$0xff pattern:$0x75316420] }
  0x12   :  { %51 = vrot.lane.b32.xlu1 %v41_v6, %s1962_s25  ;;  %364 = vst [vmem:[#allocation1 + $0x10] ss:$2 sm:$0xff] %v2002_v0 }
  0x13   :  { %47 = vrot.lane.b32.xlu0 %v39_v8, %s1962_s25  ;;  %v2036_v14 = vld.sshfl [vmem:[#allocation1] sm:$0xff pattern:$0x75316420]  ;;  %v2038_v15 = vld.sshfl [vmem:[#allocation1 + $0x8] sm:$0xff pattern:$0x75316420] }
  0x14   :  { %362 = vst [vmem:[#allocation1] ss:$2 sm:$0xff] %v2007_v1  ;;  %55 = vrot.lane.b32.xlu2 %v43_v11, %s1962_s25  ;;  %v375_v31 = vld.sshfl [vmem:[#allocation1 + $0x30] sm:$0xff pattern:$0x75316420] }
  0x15   :  { %v2042_v16 = vld.sshfl [vmem:[#allocation1 + $0x20] sm:$0xff pattern:$0x75316420]  ;;  %v2044_v17 = vld.sshfl [vmem:[#allocation1 + $0x28] sm:$0xff pattern:$0x75316420] }
  0x16   :  { %366 = vst [vmem:[#allocation1 + $0x20] ss:$2 sm:$0xff] %v2012_v2 }
  0x17   :  { %554 = vst [vmem:[#allocation1 + $0x30] ss:$2 sm:$0xff] %v543_v28 }
  0x19   :  { %v371_v18 = vld.sshfl [vmem:[#allocation1 + $0x10] sm:$0xff pattern:$0x75316420]  ;;  %v372_v19 = vld.sshfl [vmem:[#allocation1 + $0x18] sm:$0xff pattern:$0x75316420] }
  0x1a   :  { %550 = vst [vmem:[#allocation1 + $0x10] ss:$2 sm:$0xff] %v2002_v0 }
  0x1b   :  { %57 = vrot.lane.b32.xlu0 %v44_v10, %s1962_s25  ;;  %v369_v20 = vld.sshfl [vmem:[#allocation1] sm:$0xff pattern:$0x75316420]  ;;  %v370_v21 = vld.sshfl [vmem:[#allocation1 + $0x8] sm:$0xff pattern:$0x75316420] }
  0x1c   :  { %376 = vrot.lane.b32.xlu1 %v369_v20, %s1963_s26  ;;  %378 = vrot.lane.b32.xlu2 %v370_v21, %s1963_s26  ;;  %548 = vst [vmem:[#allocation1] ss:$2 sm:$0xff] %v2007_v1 }
  0x1d   :  { %v374_v22 = vld.sshfl [vmem:[#allocation1 + $0x28] sm:$0xff pattern:$0x75316420]  ;;  %v373_v23 = vld.sshfl [vmem:[#allocation1 + $0x20] sm:$0xff pattern:$0x75316420] }
  0x1e   :  { %552 = vst [vmem:[#allocation1 + $0x20] ss:$2 sm:$0xff] %v2012_v2  ;;  %v561_v37 = vld.sshfl [vmem:[#allocation1 + $0x30] sm:$0xff pattern:$0x75316420] }
  0x1f   :  { %740 = vst [vmem:[#allocation1 + $0x30] ss:$2 sm:$0xff] %v729_v33 }
  0x21   :  { %v557_v24 = vld.sshfl [vmem:[#allocation1 + $0x10] sm:$0xff pattern:$0x75316420]  ;;  %v558_v25 = vld.sshfl [vmem:[#allocation1 + $0x18] sm:$0xff pattern:$0x75316420] }
  0x22   :  { %736 = vst [vmem:[#allocation1 + $0x10] ss:$2 sm:$0xff] %v2002_v0 }
  0x23   :  { %380 = vrot.lane.b32.xlu0 %v371_v18, %s1963_s26  ;;  %v555_v26 = vld.sshfl [vmem:[#allocation1] sm:$0xff pattern:$0x75316420]  ;;  %v556_v27 = vld.sshfl [vmem:[#allocation1 + $0x8] sm:$0xff pattern:$0x75316420] }
  0x24   :  { %382 = vrot.lane.b32.xlu1 %v372_v19, %s1963_s26  ;;  %384 = vrot.lane.b32.xlu2 %v373_v23, %s1963_s26  ;;  %734 = vst [vmem:[#allocation1] ss:$2 sm:$0xff] %v2007_v1  ;;  %v1828_v18 = vld [vmem:[%s2403_s1 + $0x8] sm:$0xff] }
  0x25   :  { %v559_v29 = vld.sshfl [vmem:[#allocation1 + $0x20] sm:$0xff pattern:$0x75316420]  ;;  %v560_v30 = vld.sshfl [vmem:[#allocation1 + $0x28] sm:$0xff pattern:$0x75316420] }
  0x26   :  { %738 = vst [vmem:[#allocation1 + $0x20] ss:$2 sm:$0xff] %v2012_v2  ;;  %v747_v43 = vld.sshfl [vmem:[#allocation1 + $0x30] sm:$0xff pattern:$0x75316420] }
  0x27   :  { %926 = vst [vmem:[#allocation1 + $0x30] ss:$2 sm:$0xff] %v915_v44 }
  0x29   :  { %v743_v35 = vld.sshfl [vmem:[#allocation1 + $0x10] sm:$0xff pattern:$0x75316420]  ;;  %v744_v36 = vld.sshfl [vmem:[#allocation1 + $0x18] sm:$0xff pattern:$0x75316420] }
  0x2a   :  { %922 = vst [vmem:[#allocation1 + $0x10] ss:$2 sm:$0xff] %v2002_v0 }
  0x2b   :  { %386 = vrot.lane.b32.xlu0 %v374_v22, %s1963_s26  ;;  %v742_v32 = vld.sshfl [vmem:[#allocation1 + $0x8] sm:$0xff pattern:$0x75316420]  ;;  %v741_v34 = vld.sshfl [vmem:[#allocation1] sm:$0xff pattern:$0x75316420] }
  0x2c   :  { %562 = vrot.lane.b32.xlu1 %v555_v26, %s1964_s5  ;;  %564 = vrot.lane.b32.xlu2 %v556_v27, %s1964_s5  ;;  %920 = vst [vmem:[#allocation1] ss:$2 sm:$0xff] %v2007_v1 }
  0x2d   :  { %v745_v38 = vld.sshfl [vmem:[#allocation1 + $0x20] sm:$0xff pattern:$0x75316420]  ;;  %v746_v40 = vld.sshfl [vmem:[#allocation1 + $0x28] sm:$0xff pattern:$0x75316420] }
  0x2e   :  { %924 = vst [vmem:[#allocation1 + $0x20] ss:$2 sm:$0xff] %v2012_v2  ;;  %v933_v47 = vld.sshfl [vmem:[#allocation1 + $0x30] sm:$0xff pattern:$0x75316420] }
  0x2f   :  { %1112 = vst [vmem:[#allocation1 + $0x30] ss:$2 sm:$0xff] %v1101_v46 }
  0x31   :  { %v930_v42 = vld.sshfl [vmem:[#allocation1 + $0x18] sm:$0xff pattern:$0x75316420]  ;;  %v929_v45 = vld.sshfl [vmem:[#allocation1 + $0x10] sm:$0xff pattern:$0x75316420] }
  0x32   :  { %1108 = vst [vmem:[#allocation1 + $0x10] ss:$2 sm:$0xff] %v2002_v0 }
  0x33   :  { %566 = vrot.lane.b32.xlu0 %v557_v24, %s1964_s5  ;;  %v928_v39 = vld.sshfl [vmem:[#allocation1 + $0x8] sm:$0xff pattern:$0x75316420]  ;;  %v927_v41 = vld.sshfl [vmem:[#allocation1] sm:$0xff pattern:$0x75316420] }
  0x34   :  { %388 = vrot.lane.b32.xlu1 %v375_v31, %s1963_s26  ;;  %568 = vrot.lane.b32.xlu2 %v558_v25, %s1964_s5  ;;  %1106 = vst [vmem:[#allocation1] ss:$2 sm:$0xff] %v2007_v1 }
  0x35   :  { %v931_v48 = vld.sshfl [vmem:[#allocation1 + $0x20] sm:$0xff pattern:$0x75316420]  ;;  %v932_v49 = vld.sshfl [vmem:[#allocation1 + $0x28] sm:$0xff pattern:$0x75316420] }
  0x36   :  { %1110 = vst [vmem:[#allocation1 + $0x20] ss:$2 sm:$0xff] %v2012_v2  ;;  %v1119_v53 = vld.sshfl [vmem:[#allocation1 + $0x30] sm:$0xff pattern:$0x75316420] }
  0x37   :  { %1298 = vst [vmem:[#allocation1 + $0x30] ss:$2 sm:$0xff] %v1287_v52 }
  0x39   :  { %v1116_v50 = vld.sshfl [vmem:[#allocation1 + $0x18] sm:$0xff pattern:$0x75316420]  ;;  %v1115_v51 = vld.sshfl [vmem:[#allocation1 + $0x10] sm:$0xff pattern:$0x75316420] }
  0x3a   :  { %1294 = vst [vmem:[#allocation1 + $0x10] ss:$2 sm:$0xff] %v2002_v0 }
  0x3b   :  { %570 = vrot.lane.b32.xlu0 %v559_v29, %s1964_s5  ;;  %v1114_v54 = vld.sshfl [vmem:[#allocation1 + $0x8] sm:$0xff pattern:$0x75316420]  ;;  %v1113_v56 = vld.sshfl [vmem:[#allocation1] sm:$0xff pattern:$0x75316420] }
  0x3c   :  { %572 = vrot.lane.b32.xlu1 %v560_v30, %s1964_s5  ;;  %574 = vrot.lane.b32.xlu2 %v561_v37, %s1964_s5  ;;  %1292 = vst [vmem:[#allocation1] ss:$2 sm:$0xff] %v2007_v1  ;;  %v1853_v37 = vld [vmem:[%s2403_s1 + $0x10] sm:$0xff] }
  0x3d   :  { %v1118_v55 = vld.sshfl [vmem:[#allocation1 + $0x28] sm:$0xff pattern:$0x75316420]  ;;  %v1117_v57 = vld.sshfl [vmem:[#allocation1 + $0x20] sm:$0xff pattern:$0x75316420] }
  0x3e   :  { %1296 = vst [vmem:[#allocation1 + $0x20] ss:$2 sm:$0xff] %v2012_v2  ;;  %v1305_v4 = vld.sshfl [vmem:[#allocation1 + $0x30] sm:$0xff pattern:$0x75316420] }
  0x3f   :  { %1484 = vst [vmem:[#allocation1 + $0x30] ss:$2 sm:$0xff] %v1473_v5 }
  0x41   :  { %v1301_v60 = vld.sshfl [vmem:[#allocation1 + $0x10] sm:$0xff pattern:$0x75316420]  ;;  %v1302_v63 = vld.sshfl [vmem:[#allocation1 + $0x18] sm:$0xff pattern:$0x75316420] }
  0x42   :  { %1480 = vst [vmem:[#allocation1 + $0x10] ss:$2 sm:$0xff] %v2002_v0 }
  0x43   :  { %748 = vrot.lane.b32.xlu0 %v741_v34, %s1965_s10  ;;  %v1300_v61 = vld.sshfl [vmem:[#allocation1 + $0x8] sm:$0xff pattern:$0x75316420]  ;;  %v1299_v62 = vld.sshfl [vmem:[#allocation1] sm:$0xff pattern:$0x75316420] }
  0x44   :  { %750 = vrot.lane.b32.xlu1 %v742_v32, %s1965_s10  ;;  %752 = vrot.lane.b32.xlu2 %v743_v35, %s1965_s10  ;;  %1478 = vst [vmem:[#allocation1] ss:$2 sm:$0xff] %v2007_v1 }
  0x45   :  { %v1303_v58 = vld.sshfl [vmem:[#allocation1 + $0x20] sm:$0xff pattern:$0x75316420]  ;;  %v1304_v59 = vld.sshfl [vmem:[#allocation1 + $0x28] sm:$0xff pattern:$0x75316420] }
  0x46   :  { %1482 = vst [vmem:[#allocation1 + $0x20] ss:$2 sm:$0xff] %v2012_v2  ;;  %v1491_v35 = vld.sshfl [vmem:[#allocation1 + $0x30] sm:$0xff pattern:$0x75316420] }
  0x4b   :  { %754 = vrot.lane.b32.xlu0 %v744_v36, %s1965_s10  ;;  %v1485_v23 = vld.sshfl [vmem:[#allocation1] sm:$0xff pattern:$0x75316420]  ;;  %v1486_v24 = vld.sshfl [vmem:[#allocation1 + $0x8] sm:$0xff pattern:$0x75316420] }
  0x4c   :  { %756 = vrot.lane.b32.xlu1 %v745_v38, %s1965_s10  ;;  %758 = vrot.lane.b32.xlu2 %v746_v40, %s1965_s10 }
  0x4d   :  { %v1489_v28 = vld.sshfl [vmem:[#allocation1 + $0x20] sm:$0xff pattern:$0x75316420] }
  0x53   :  { %934 = vrot.lane.b32.xlu0 %v927_v41, %s1966_s13 }
  0x54   :  { %936 = vrot.lane.b32.xlu1 %v928_v39, %s1966_s13  ;;  %938 = vrot.lane.b32.xlu2 %v929_v45, %s1966_s13 }
  0x5b   :  { %760 = vrot.lane.b32.xlu0 %v747_v43, %s1965_s10 }
  0x5c   :  { %940 = vrot.lane.b32.xlu1 %v930_v42, %s1966_s13  ;;  %942 = vrot.lane.b32.xlu2 %v931_v48, %s1966_s13 }
  0x63   :  { %944 = vrot.lane.b32.xlu0 %v932_v49, %s1966_s13 }
  0x64   :  { %946 = vrot.lane.b32.xlu1 %v933_v47, %s1966_s13  ;;  %1120 = vrot.lane.b32.xlu2 %v1113_v56, %s1967_s14  ;;  %v1866_v47 = vld [vmem:[%s2403_s1 + $0x18] sm:$0xff] }
  0x66   :  { %v54_v3 = vpop.permute.xlu2 %53 }
  0x6b   :  { %1122 = vrot.lane.b32.xlu0 %v1114_v54, %s1967_s14 }
  0x6c   :  { %1124 = vrot.lane.b32.xlu1 %v1115_v51, %s1967_s14  ;;  %1126 = vrot.lane.b32.xlu2 %v1116_v50, %s1967_s14 }
  0x6e   :  { %v56_v2 = vpop.permute.xlu2 %55 }
  0x6f   :  { %v64_v22 = vsel %vm59_vm1, %v54_v3, %v56_v2 }
  0x73   :  { %1128 = vrot.lane.b32.xlu0 %v1117_v57, %s1967_s14  ;;  %v1879_v57 = vld [vmem:[%s2403_s1 + $0x20] sm:$0xff] }
  0x74   :  { %1130 = vrot.lane.b32.xlu1 %v1118_v55, %s1967_s14  ;;  %1306 = vrot.lane.b32.xlu2 %v1299_v62, %s1968_s17 }
  0x76   :  { %v2099_v6 = vpop.permute.xlu2 %378 }
  0x7b   :  { %1308 = vrot.lane.b32.xlu0 %v1300_v61, %s1968_s17 }
  0x7c   :  { %1310 = vrot.lane.b32.xlu1 %v1301_v60, %s1968_s17  ;;  %v50_v0 = vpop.permute.xlu1 %49  ;;  %1132 = vrot.lane.b32.xlu2 %v1119_v53, %s1967_s14 }
  0x7d   :  { %v46_v1 = vpop.permute.xlu0 %45 }
  0x7e   :  { %v2103_v7 = vpop.permute.xlu2 %384 }
  0x83   :  { %1312 = vrot.lane.b32.xlu0 %v1302_v63, %s1968_s17 }
  0x84   :  { %1314 = vrot.lane.b32.xlu1 %v1303_v58, %s1968_s17  ;;  %v52_v8 = vpop.permute.xlu1 %51  ;;  %1316 = vrot.lane.b32.xlu2 %v1304_v59, %s1968_s17 }
  0x85   :  { %v48_v9 = vpop.permute.xlu0 %47  ;;  %v62_v10 = vsel %vm59_vm1, %v50_v0, %v52_v8  ;;  %v63_v11 = vsel %vm59_vm1, %v52_v8, %v54_v3 }
  0x86   :  { %v60_v19 = vsel %vm59_vm1, %v46_v1, %v48_v9  ;;  %v61_v20 = vsel %vm59_vm1, %v48_v9, %v50_v0  ;;  %1833 = vmatpush.msk.msra.mxu2 %vm70_vm0, %v62_v10  ;;  %1835 = vmatpush.msk.msra.mxu3 %vm70_vm0, %v63_v11  ;;  %v2117_v21 = vpop.permute.xlu2 %564 }
  0x87   :  { %1829 = vmatpush.msk.msra.mxu0 %vm70_vm0, %v60_v19  ;;  %1831 = vmatpush.msk.msra.mxu1 %vm70_vm0, %v61_v20 }
  0x88   :  { %1830 = vmatmul.msk.f32.vlgmr.msra.gmra.mxu0 %vm66_vm2, %v1828_v18  ;;  %1832 = vmatmul.msk.f32.vlgmr.msra.gmra.mxu1 %vm66_vm2, %v1828_v18 }
  0x89   :  { %1837 = vmatpush.msk.msrb.mxu0 %vm70_vm0, %v64_v22  ;;  %1834 = vmatmul.msk.f32.vlgmr.msra.gmra.mxu2 %vm66_vm2, %v1828_v18 }
  0x8a   :  { %1836 = vmatmul.msk.f32.vlgmr.msra.gmra.mxu3 %vm66_vm2, %v1828_v18  ;;  %1841 = vmatpush.msk.msrb.mxu2 %vm70_vm0, %v2036_v14  ;;  %v17_v14 = vld [vmem:[%s2403_s1] sm:$0xff] }
  0x8b   :  { %1845 = vmatpush.msk.msra.mxu0 %vm70_vm0, %v2029_v12  ;;  %1318 = vrot.lane.b32.xlu0 %v1305_v4, %s1968_s17 }
  0x8c   :  { %1492 = vrot.lane.b32.xlu1 %v1485_v23, %s1969_s19  ;;  %1843 = vmatpush.msk.msrb.mxu3 %vm70_vm0, %v2038_v15 }
  0x8d   :  { %v58_v25 = vpop.permute.xlu0 %57  ;;  %1849 = vmatpush.msk.msra.mxu2 %vm70_vm0, %v2042_v16  ;;  %1494 = vrot.lane.b32.xlu2 %v1486_v24, %s1969_s19  ;;  %v1487_v16 = vld.sshfl [vmem:[#allocation1 + $0x10] sm:$0xff pattern:$0x75316420] }
  0x8e   :  { %1851 = vmatpush.msk.msra.mxu3 %vm70_vm0, %v2044_v17  ;;  %v377_v12 = vpop.permute.xlu1 %376  ;;  %v65_v26 = vsel %vm59_vm1, %v56_v2, %v58_v25  ;;  %v569_v27 = vpop.permute.xlu2 %568  ;;  %v1488_v17 = vld.sshfl [vmem:[#allocation1 + $0x18] sm:$0xff pattern:$0x75316420] }
  0x8f   :  { %v391_v15 = vsel %vm390_vm3, %v377_v12, %v2099_v6  ;;  %1839 = vmatpush.msk.msrb.mxu1 %vm70_vm0, %v65_v26 }
  0x90   :  { %1838 = vmatmul.msk.f32.vlgmr.msrb.gmra.mxu0 %vm66_vm2, %v1828_v18  ;;  %1840 = vmatmul.msk.f32.vlgmr.msrb.gmra.mxu1 %vm66_vm2, %v1828_v18 }
  0x91   :  { %1854 = vmatpush.msk.msrb.mxu0 %vm70_vm0, %v391_v15  ;;  %1842 = vmatmul.msk.f32.vlgmr.msrb.gmra.mxu2 %vm66_vm2, %v17_v14 }
  0x92   :  { %1844 = vmatmul.msk.f32.vlgmr.msrb.gmra.mxu3 %vm66_vm2, %v17_v14  ;;  %1847 = vmatpush.msk.msra.mxu1 %vm70_vm0, %v2031_v13  ;;  %v1490_v13 = vld.sshfl [vmem:[#allocation1 + $0x28] sm:$0xff pattern:$0x75316420] }
  0x93   :  { %1496 = vrot.lane.b32.xlu0 %v1487_v16, %s1969_s19 }
  0x94   :  { %1498 = vrot.lane.b32.xlu1 %v1488_v17, %s1969_s19 }
  0x95   :  { %v381_v29 = vpop.permute.xlu0 %380  ;;  %1500 = vrot.lane.b32.xlu2 %v1489_v28, %s1969_s19 }
  0x96   :  { %v392_v30 = vsel %vm390_vm3, %v2099_v6, %v381_v29  ;;  %v383_v31 = vpop.permute.xlu1 %382  ;;  %v575_v32 = vpop.permute.xlu2 %574  ;;  %v1892_v6 = vld [vmem:[%s2403_s1 + $0x28] sm:$0xff] }
  0x97   :  { %v393_v33 = vsel %vm390_vm3, %v381_v29, %v383_v31  ;;  %v394_v34 = vsel %vm390_vm3, %v383_v31, %v2103_v7  ;;  %1856 = vmatpush.msk.msrb.mxu1 %vm70_vm0, %v392_v30 }
  0x98   :  { %1858 = vmatpush.msk.msrb.mxu2 %vm70_vm0, %v393_v33  ;;  %1846 = vmatmul.msk.f32.vlgmr.msra.gmra.mxu0 %vm66_vm2, %v17_v14  ;;  %v1918_v33 = vld [vmem:[%s2403_s1 + $0x38] sm:$0xff] }
  0x99   :  { %1848 = vmatmul.msk.f32.vlgmr.msra.gmra.mxu1 %vm66_vm2, %v17_v14  ;;  %1860 = vmatpush.msk.msrb.mxu3 %vm70_vm0, %v394_v34 }
  0x9a   :  { %1852 = vmatmul.msk.f32.vlgmr.msra.gmra.mxu3 %vm66_vm2, %v17_v14  ;;  %1850 = vmatmul.msk.f32.vlgmr.msra.gmra.mxu2 %vm66_vm2, %v17_v14  ;;  %v1905_v14 = vld [vmem:[%s2403_s1 + $0x30] sm:$0xff] }
  0x9b   :  { %1502 = vrot.lane.b32.xlu0 %v1490_v13, %s1969_s19 }
  0x9c   :  { %1504 = vrot.lane.b32.xlu1 %v1491_v35, %s1969_s19 }
  0x9d   :  { %v387_v36 = vpop.permute.xlu0 %386 }
  0x9e   :  { %v395_v38 = vsel %vm390_vm3, %v2103_v7, %v387_v36  ;;  %v563_v39 = vpop.permute.xlu1 %562  ;;  %v753_v40 = vpop.permute.xlu2 %752 }
  0x9f   :  { %v577_v41 = vsel %vm576_vm4, %v563_v39, %v2117_v21  ;;  %1862 = vmatpush.msk.msra.mxu0 %vm70_vm0, %v395_v38 }
  0xa0   :  { %1855 = vmatmul.msk.f32.vlgmr.msrb.gmra.mxu0 %vm66_vm2, %v1853_v37  ;;  %1867 = vmatpush.msk.msra.mxu2 %vm70_vm0, %v577_v41 }
  0xa1   :  { %1857 = vmatmul.msk.f32.vlgmr.msrb.gmra.mxu1 %vm66_vm2, %v1853_v37 }
  0xa2   :  { %1861 = vmatmul.msk.f32.vlgmr.msrb.gmra.mxu3 %vm66_vm2, %v1853_v37  ;;  %1859 = vmatmul.msk.f32.vlgmr.msrb.gmra.mxu2 %vm66_vm2, %v1853_v37 }
  0xa5   :  { %v567_v42 = vpop.permute.xlu0 %566 }
  0xa6   :  { %v578_v43 = vsel %vm576_vm4, %v2117_v21, %v567_v42  ;;  %v579_v44 = vsel %vm576_vm4, %v567_v42, %v569_v27  ;;  %v389_v45 = vpop.permute.xlu1 %388  ;;  %v759_v48 = vpop.permute.xlu2 %758 }
  0xa7   :  { %v396_v46 = vsel %vm390_vm3, %v387_v36, %v389_v45  ;;  %1869 = vmatpush.msk.msra.mxu3 %vm70_vm0, %v578_v43  ;;  %1871 = vmatpush.msk.msrb.mxu0 %vm70_vm0, %v579_v44 }
  0xa8   :  { %1864 = vmatpush.msk.msra.mxu1 %vm70_vm0, %v396_v46  ;;  %1863 = vmatmul.msk.f32.vlgmr.msra.gmra.mxu0 %vm66_vm2, %v1853_v37  ;;  %v1931_v46 = vld [vmem:[%s2403_s1 + $0x40] sm:$0xff] }
  0xa9   :  { %1865 = vmatmul.msk.f32.vlgmr.msra.gmra.mxu1 %vm66_vm2, %v1853_v37 }
  0xaa   :  { %1870 = vmatmul.msk.f32.vlgmr.msra.gmra.mxu3 %vm66_vm2, %v1866_v47  ;;  %1868 = vmatmul.msk.f32.vlgmr.msra.gmra.mxu2 %vm66_vm2, %v1866_v47 }
  0xad   :  { %v571_v49 = vpop.permute.xlu0 %570 }
  0xae   :  { %v580_v50 = vsel %vm576_vm4, %v569_v27, %v571_v49  ;;  %v573_v51 = vpop.permute.xlu1 %572  ;;  %v939_v54 = vpop.permute.xlu2 %938 }
  0xaf   :  { %v581_v52 = vsel %vm576_vm4, %v571_v49, %v573_v51  ;;  %v582_v53 = vsel %vm576_vm4, %v573_v51, %v575_v32  ;;  %1873 = vmatpush.msk.msrb.mxu1 %vm70_vm0, %v580_v50 }
  0xb0   :  { %1875 = vmatpush.msk.msrb.mxu2 %vm70_vm0, %v581_v52  ;;  %1872 = vmatmul.msk.f32.vlgmr.msrb.gmra.mxu0 %vm66_vm2, %v1866_v47 }
  0xb1   :  { %1874 = vmatmul.msk.f32.vlgmr.msrb.gmra.mxu1 %vm66_vm2, %v1866_v47  ;;  %1877 = vmatpush.msk.msrb.mxu3 %vm70_vm0, %v582_v53 }
  0xb2   :  { %1878 = vmatmul.msk.f32.vlgmr.msrb.gmra.mxu3 %vm66_vm2, %v1866_v47  ;;  %1876 = vmatmul.msk.f32.vlgmr.msrb.gmra.mxu2 %vm66_vm2, %v1866_v47 }
  0xb5   :  { %v749_v55 = vpop.permute.xlu0 %748 }
  0xb6   :  { %v751_v56 = vpop.permute.xlu1 %750  ;;  %v943_v60 = vpop.permute.xlu2 %942 }
  0xb7   :  { %v764_v58 = vsel %vm762_vm5, %v751_v56, %v753_v40  ;;  %v763_v59 = vsel %vm762_vm5, %v749_v55, %v751_v56 }
  0xb8   :  { %1880 = vmatpush.msk.msra.mxu0 %vm70_vm0, %v763_v59  ;;  %1882 = vmatpush.msk.msra.mxu1 %vm70_vm0, %v764_v58 }
  0xb9   :  { %1881 = vmatmul.msk.f32.vlgmr.msra.gmra.mxu0 %vm66_vm2, %v1879_v57  ;;  %1883 = vmatmul.msk.f32.vlgmr.msra.gmra.mxu1 %vm66_vm2, %v1879_v57 }
  0xbd   :  { %v755_v61 = vpop.permute.xlu0 %754 }
  0xbe   :  { %v757_v62 = vpop.permute.xlu1 %756  ;;  %v765_v63 = vsel %vm762_vm5, %v753_v40, %v755_v61  ;;  %v1121_v0 = vpop.permute.xlu2 %1120 }
  0xbf   :  { %v767_v3 = vsel %vm762_vm5, %v757_v62, %v759_v48  ;;  %v766_v4 = vsel %vm762_vm5, %v755_v61, %v757_v62  ;;  %1884 = vmatpush.msk.msra.mxu2 %vm70_vm0, %v765_v63 }
  0xc0   :  { %1886 = vmatpush.msk.msra.mxu3 %vm70_vm0, %v766_v4  ;;  %1888 = vmatpush.msk.msrb.mxu0 %vm70_vm0, %v767_v3 }
  0xc1   :  { %1885 = vmatmul.msk.f32.vlgmr.msra.gmra.mxu2 %vm66_vm2, %v1879_v57  ;;  %1887 = vmatmul.msk.f32.vlgmr.msra.gmra.mxu3 %vm66_vm2, %v1879_v57 }
  0xc2   :  { %1889 = vmatmul.msk.f32.vlgmr.msrb.gmra.mxu0 %vm66_vm2, %v1879_v57 }
  0xc5   :  { %v935_v5 = vpop.permute.xlu0 %934 }
  0xc6   :  { %v937_v2 = vpop.permute.xlu1 %936  ;;  %v1127_v19 = vpop.permute.xlu2 %1126 }
  0xc7   :  { %v950_v1 = vsel %vm948_vm6, %v937_v2, %v939_v54  ;;  %v949_v7 = vsel %vm948_vm6, %v935_v5, %v937_v2 }
  0xc8   :  { %1893 = vmatpush.msk.msrb.mxu2 %vm70_vm0, %v949_v7  ;;  %1895 = vmatpush.msk.msrb.mxu3 %vm70_vm0, %v950_v1 }
  0xc9   :  { %1894 = vmatmul.msk.f32.vlgmr.msrb.gmra.mxu2 %vm66_vm2, %v1892_v6  ;;  %1896 = vmatmul.msk.f32.vlgmr.msrb.gmra.mxu3 %vm66_vm2, %v1892_v6 }
  0xcd   :  { %v761_v8 = vpop.permute.xlu0 %760 }
  0xce   :  { %v941_v9 = vpop.permute.xlu1 %940  ;;  %v768_v10 = vsel %vm762_vm5, %v759_v48, %v761_v8  ;;  %v1307_v24 = vpop.permute.xlu2 %1306  ;;  %v1970_v48 = vmov 2  }
  0xcf   :  { %v951_v11 = vsel %vm948_vm6, %v939_v54, %v941_v9  ;;  %v952_v18 = vsel %vm948_vm6, %v941_v9, %v943_v60  ;;  %1890 = vmatpush.msk.msrb.mxu1 %vm70_vm0, %v768_v10  ;;  %1956 = vset.pattern.permute.xlu2 %v1970_v48 }
  0xd0   :  { %1897 = vmatpush.msk.msra.mxu0 %vm70_vm0, %v951_v11  ;;  %1891 = vmatmul.msk.f32.vlgmr.msrb.gmra.mxu1 %vm66_vm2, %v1879_v57  ;;  %v2308_v57 = vld [vmem:[%s2404_s2] sm:$0xff] }
  0xd1   :  { %1898 = vmatmul.msk.f32.vlgmr.msra.gmra.mxu0 %vm66_vm2, %v1892_v6  ;;  %1899 = vmatpush.msk.msra.mxu1 %vm70_vm0, %v952_v18 }
  0xd2   :  { %1657 = vperm.xlu2 %1956, %v2308_v57  }
  0xd5   :  { %v945_v20 = vpop.permute.xlu0 %944 }
  0xd6   :  { %v947_v21 = vpop.permute.xlu1 %946  ;;  %v953_v22 = vsel %vm948_vm6, %v943_v60, %v945_v20  ;;  %v1133_v16 = vpop.permute.xlu2 %1132 }
  0xd7   :  { %v954_v23 = vsel %vm948_vm6, %v945_v20, %v947_v21  ;;  %1901 = vmatpush.msk.msra.mxu2 %vm70_vm0, %v953_v22 }
  0xd8   :  { %1903 = vmatpush.msk.msra.mxu3 %vm70_vm0, %v954_v23  ;;  %1900 = vmatmul.msk.f32.vlgmr.msra.gmra.mxu1 %vm66_vm2, %v1892_v6 }
  0xd9   :  { %1902 = vmatmul.msk.f32.vlgmr.msra.gmra.mxu2 %vm66_vm2, %v1892_v6  ;;  %1904 = vmatmul.msk.f32.vlgmr.msra.gmra.mxu3 %vm66_vm2, %v1892_v6 }
  0xdd   :  { %v1123_v25 = vpop.permute.xlu0 %1122 }
  0xde   :  { %v1125_v12 = vpop.permute.xlu1 %1124  ;;  %v1135_v26 = vsel %vm1134_vm7, %v1121_v0, %v1123_v25  ;;  %v1317_v36 = vpop.permute.xlu2 %1316 }
  0xdf   :  { %v1137_v27 = vsel %vm1134_vm7, %v1125_v12, %v1127_v19  ;;  %v1136_v15 = vsel %vm1134_vm7, %v1123_v25, %v1125_v12  ;;  %1906 = vmatpush.msk.msrb.mxu0 %vm70_vm0, %v1135_v26 }
  0xe0   :  { %1908 = vmatpush.msk.msrb.mxu1 %vm70_vm0, %v1136_v15  ;;  %1910 = vmatpush.msk.msrb.mxu2 %vm70_vm0, %v1137_v27 }
  0xe1   :  { %1907 = vmatmul.msk.f32.vlgmr.msrb.gmra.mxu0 %vm66_vm2, %v1905_v14  ;;  %1909 = vmatmul.msk.f32.vlgmr.msrb.gmra.mxu1 %vm66_vm2, %v1905_v14 }
  0xe2   :  { %1911 = vmatmul.msk.f32.vlgmr.msrb.gmra.mxu2 %vm66_vm2, %v1905_v14 }
  0xe5   :  { %v1129_v17 = vpop.permute.xlu0 %1128 }
  0xe6   :  { %v1131_v28 = vpop.permute.xlu1 %1130  ;;  %v1138_v29 = vsel %vm1134_vm7, %v1127_v19, %v1129_v17 }
  0xe7   :  { %v1139_v30 = vsel %vm1134_vm7, %v1129_v17, %v1131_v28  ;;  %v1140_v31 = vsel %vm1134_vm7, %v1131_v28, %v1133_v16  ;;  %1912 = vmatpush.msk.msrb.mxu3 %vm70_vm0, %v1138_v29  ;;  %v1495_v42 = vpop.permute.xlu2 %1494 }
  0xe8   :  { %1914 = vmatpush.msk.msra.mxu0 %vm70_vm0, %v1139_v30  ;;  %1916 = vmatpush.msk.msra.mxu1 %vm70_vm0, %v1140_v31 }
  0xe9   :  { %1913 = vmatmul.msk.f32.vlgmr.msrb.gmra.mxu3 %vm66_vm2, %v1905_v14  ;;  %1915 = vmatmul.msk.f32.vlgmr.msra.gmra.mxu0 %vm66_vm2, %v1905_v14 }
  0xea   :  { %1917 = vmatmul.msk.f32.vlgmr.msra.gmra.mxu1 %vm66_vm2, %v1905_v14 }
  0xed   :  { %v1309_v32 = vpop.permute.xlu0 %1308 }
  0xee   :  { %v1311_v34 = vpop.permute.xlu1 %1310  ;;  %v1321_v13 = vsel %vm1320_vm8, %v1307_v24, %v1309_v32 }
  0xef   :  { %v1322_v35 = vsel %vm1320_vm8, %v1309_v32, %v1311_v34  ;;  %1919 = vmatpush.msk.msra.mxu2 %vm70_vm0, %v1321_v13  ;;  %v1501_v49 = vpop.permute.xlu2 %1500 }
  0xf0   :  { %1921 = vmatpush.msk.msra.mxu3 %vm70_vm0, %v1322_v35  ;;  %1920 = vmatmul.msk.f32.vlgmr.msra.gmra.mxu2 %vm66_vm2, %v1918_v33 }
  0xf1   :  { %1922 = vmatmul.msk.f32.vlgmr.msra.gmra.mxu3 %vm66_vm2, %v1918_v33 }
  0xf5   :  { %v1313_v37 = vpop.permute.xlu0 %1312 }
  0xf6   :  { %v1315_v38 = vpop.permute.xlu1 %1314  ;;  %v1323_v39 = vsel %vm1320_vm8, %v1311_v34, %v1313_v37 }
  0xf7   :  { %v1324_v40 = vsel %vm1320_vm8, %v1313_v37, %v1315_v38  ;;  %v1325_v41 = vsel %vm1320_vm8, %v1315_v38, %v1317_v36  ;;  %1923 = vmatpush.msk.msrb.mxu0 %vm70_vm0, %v1323_v39 }
  0xf8   :  { %1925 = vmatpush.msk.msrb.mxu1 %vm70_vm0, %v1324_v40  ;;  %1927 = vmatpush.msk.msrb.mxu2 %vm70_vm0, %v1325_v41 }
  0xf9   :  { %1924 = vmatmul.msk.f32.vlgmr.msrb.gmra.mxu0 %vm66_vm2, %v1918_v33  ;;  %1926 = vmatmul.msk.f32.vlgmr.msrb.gmra.mxu1 %vm66_vm2, %v1918_v33 }
  0xfa   :  { %1928 = vmatmul.msk.f32.vlgmr.msrb.gmra.mxu2 %vm66_vm2, %v1918_v33 }
  0xfd   :  { %v1319_v43 = vpop.permute.xlu0 %1318 }
  0xfe   :  { %v1326_v44 = vsel %vm1320_vm8, %v1317_v36, %v1319_v43  ;;  %v1493_v45 = vpop.permute.xlu1 %1492 }
  0xff   :  { %v1507_v47 = vsel %vm1506_vm9, %v1493_v45, %v1495_v42  ;;  %1929 = vmatpush.msk.msrb.mxu3 %vm70_vm0, %v1326_v44 }
 0x100   :  { %1932 = vmatpush.msk.msra.mxu0 %vm70_vm0, %v1507_v47  ;;  %1930 = vmatmul.msk.f32.vlgmr.msrb.gmra.mxu3 %vm66_vm2, %v1918_v33 }
 0x101   :  { %1933 = vmatmul.msk.f32.vlgmr.msra.gmra.mxu0 %vm66_vm2, %v1931_v46 }
 0x105   :  { %v2298_v50 = vpop.f32.mrf.mxu0  ;;  %v120_v51 = vpop.f32.mrf.mxu1 }
 0x106   :  { %v1497_v52 = vpop.permute.xlu0 %1496  ;;  %v1499_v53 = vpop.permute.xlu1 %1498 }
 0x107   :  { %v1508_v54 = vsel %vm1506_vm9, %v1495_v42, %v1497_v52  ;;  %v1509_v55 = vsel %vm1506_vm9, %v1497_v52, %v1499_v53  ;;  %v1510_v56 = vsel %vm1506_vm9, %v1499_v53, %v1501_v49 }
 0x108   :  { %1934 = vmatpush.msk.msra.mxu1 %vm70_vm0, %v1508_v54  ;;  %1936 = vmatpush.msk.msra.mxu2 %vm70_vm0, %v1509_v55 }
 0x109   :  { %1938 = vmatpush.msk.msra.mxu3 %vm70_vm0, %v1510_v56  ;;  %1935 = vmatmul.msk.f32.vlgmr.msra.gmra.mxu1 %vm66_vm2, %v1931_v46 }
 0x10a   :  { %1937 = vmatmul.msk.f32.vlgmr.msra.gmra.mxu2 %vm66_vm2, %v1931_v46  ;;  %1939 = vmatmul.msk.f32.vlgmr.msra.gmra.mxu3 %vm66_vm2, %v1931_v46 }
 0x10c   :  { %v140_v58 = vpop.f32.mrf.mxu2 }
 0x10d   :  { %v180_v59 = vpop.f32.mrf.mxu0  ;;  %v200_v60 = vpop.f32.mrf.mxu1 }
 0x10e   :  { %v1503_v61 = vpop.permute.xlu0 %1502  ;;  %v1505_v62 = vpop.permute.xlu1 %1504 }
 0x10f   :  { %v1511_v63 = vsel %vm1506_vm9, %v1501_v49, %v1503_v61  ;;  %v1512_v3 = vsel %vm1506_vm9, %v1503_v61, %v1505_v62  ;;  %v160_v4 = vpop.f32.mrf.mxu3 }
 0x110   :  { %1940 = vmatpush.msk.msrb.mxu0 %vm70_vm0, %v1511_v63  ;;  %1942 = vmatpush.msk.msrb.mxu1 %vm70_vm0, %v1512_v3 }
 0x111   :  { %1941 = vmatmul.msk.f32.vlgmr.msrb.gmra.mxu0 %vm66_vm2, %v1931_v46  ;;  %1943 = vmatmul.msk.f32.vlgmr.msrb.gmra.mxu1 %vm66_vm2, %v1931_v46 }
 0x114   :  { %v249_v5 = vpop.f32.mrf.mxu2 }
 0x115   :  { %v289_v2 = vpop.f32.mrf.mxu0  ;;  %v250_v42 = vadd.f32 %v249_v5, %v2298_v50 }
 0x116   :  { %v290_v6 = vadd.f32 %v289_v2, %v140_v58  ;;  %v309_v0 = vpop.f32.mrf.mxu1 }
 0x117   :  { %v310_v1 = vadd.f32 %v309_v0, %v160_v4  ;;  %v269_v7 = vpop.f32.mrf.mxu3 }
 0x118   :  { %v270_v8 = vadd.f32 %v269_v7, %v120_v51 }
 0x11d   :  { %v429_v9 = vpop.f32.mrf.mxu0  ;;  %v329_v10 = vpop.f32.mrf.mxu2 }
 0x11e   :  { %v449_v11 = vpop.f32.mrf.mxu1  ;;  %v330_v18 = vadd.f32 %v329_v10, %v180_v59  ;;  %v532_v45 = vadd.f32 %v429_v9, %v250_v42 }
 0x11f   :  { %v349_v19 = vpop.f32.mrf.mxu3  ;;  %v533_v53 = vadd.f32 %v449_v11, %v270_v8 }
 0x120   :  { %v350_v20 = vadd.f32 %v349_v19, %v200_v60 }
 0x125   :  { %v509_v21 = vpop.f32.mrf.mxu0  ;;  %v469_v25 = vpop.f32.mrf.mxu2 }
 0x126   :  { %v536_v22 = vadd.f32 %v509_v21, %v330_v18  ;;  %v529_v23 = vpop.f32.mrf.mxu1  ;;  %v534_v50 = vadd.f32 %v469_v25, %v290_v6 }
 0x127   :  { %v2321_v24 = vadd.f32 %v529_v23, %v350_v20  ;;  %v489_v12 = vpop.f32.mrf.mxu3 }
 0x128   :  { %v535_v3 = vadd.f32 %v489_v12, %v310_v1 }
 0x12c   :  { %v1658_v59 = vpop.permute.xlu2 %1657 }
 0x12d   :  { %v655_v26 = vpop.f32.mrf.mxu0  ;;  %v615_v14 = vpop.f32.mrf.mxu2 }
 0x12e   :  { %v675_v15 = vpop.f32.mrf.mxu1  ;;  %v718_v46 = vadd.f32 %v615_v14, %v532_v45  ;;  %v720_v7 = vadd.f32 %v655_v26, %v534_v50 }
 0x12f   :  { %v635_v27 = vpop.f32.mrf.mxu3  ;;  %v721_v9 = vadd.f32 %v675_v15, %v535_v3 }
 0x130   :  { %v719_v56 = vadd.f32 %v635_v27, %v533_v53 }
 0x135   :  { %v695_v17 = vpop.f32.mrf.mxu2 }
 0x136   :  { %v801_v16 = vpop.f32.mrf.mxu0  ;;  %v821_v29 = vpop.f32.mrf.mxu1  ;;  %v722_v8 = vadd.f32 %v695_v17, %v536_v22 }
 0x137   :  { %v715_v28 = vpop.f32.mrf.mxu3  ;;  %v904_v49 = vadd.f32 %v801_v16, %v718_v46  ;;  %v905_v62 = vadd.f32 %v821_v29, %v719_v56 }
 0x138   :  { %v723_v25 = vadd.f32 %v715_v28, %v2321_v24 }
 0x13f   :  { %v881_v30 = vpop.f32.mrf.mxu0 }
 0x140   :  { %v908_v21 = vadd.f32 %v881_v30, %v722_v8 }
 0x144   :  { %v841_v31 = vpop.f32.mrf.mxu2  ;;  %v861_v32 = vpop.f32.mrf.mxu3 }
 0x145   :  { %v906_v18 = vadd.f32 %v841_v31, %v720_v7  ;;  %v907_v19 = vadd.f32 %v861_v32, %v721_v9 }
 0x14c   :  { %v987_v13 = vpop.f32.mrf.mxu2  ;;  %v1007_v35 = vpop.f32.mrf.mxu3 }
 0x14d   :  { %v901_v33 = vpop.f32.mrf.mxu1  ;;  %v1090_v51 = vadd.f32 %v987_v13, %v904_v49  ;;  %v1091_v4 = vadd.f32 %v1007_v35, %v905_v62 }
 0x14e   :  { %v1027_v34 = vpop.f32.mrf.mxu0  ;;  %v909_v26 = vadd.f32 %v901_v33, %v723_v25 }
 0x14f   :  { %v1092_v14 = vadd.f32 %v1027_v34, %v906_v18 }
 0x155   :  { %v1047_v36 = vpop.f32.mrf.mxu1 }
 0x156   :  { %v1093_v27 = vadd.f32 %v1047_v36, %v907_v19 }
 0x15c   :  { %v1067_v38 = vpop.f32.mrf.mxu2  ;;  %v1087_v39 = vpop.f32.mrf.mxu3 }
 0x15d   :  { %v1094_v6 = vadd.f32 %v1067_v38, %v908_v21  ;;  %v1095_v13 = vadd.f32 %v1087_v39, %v909_v26  ;;  %v1678_v39 = vlaneseq }
 0x15e   :  { %v1173_v37 = vpop.f32.mrf.mxu0  ;;  %v1193_v40 = vpop.f32.mrf.mxu1 }
 0x15f   :  { %v1276_v54 = vadd.f32 %v1173_v37, %v1090_v51  ;;  %v1277_v2 = vadd.f32 %v1193_v40, %v1091_v4 }
 0x165   :  { %v1213_v44 = vpop.f32.mrf.mxu2 }
 0x166   :  { %v1253_v41 = vpop.f32.mrf.mxu0  ;;  %v1278_v12 = vadd.f32 %v1213_v44, %v1092_v14 }
 0x167   :  { %v1273_v47 = vpop.f32.mrf.mxu1  ;;  %v1280_v29 = vadd.f32 %v1253_v41, %v1094_v6 }
 0x168   :  { %v1281_v37 = vadd.f32 %v1273_v47, %v1095_v13 }
 0x16c   :  { %v1233_v43 = vpop.f32.mrf.mxu3 }
 0x16d   :  { %v1279_v16 = vadd.f32 %v1233_v43, %v1093_v27  ;;  %v1679_v43 = vand.u32 127, %v1678_v39 }
 0x16f   :  { %vm1680_vm10 = vcmp.lt.s32.totalorder %v1679_v43, 127  ;;  %vm1705_vm11 = vcmp.lt.s32.totalorder %v1679_v43, 110 }
 0x173   :  { %v1359_v52 = vpop.f32.mrf.mxu2 }
 0x174   :  { %v1379_v55 = vpop.f32.mrf.mxu3  ;;  %v1462_v58 = vadd.f32 %v1359_v52, %v1276_v54 }
 0x175   :  { %v1463_v10 = vadd.f32 %v1379_v55, %v1277_v2 }
 0x176   :  { %v1399_v48 = vpop.f32.mrf.mxu0  ;;  %v1419_v60 = vpop.f32.mrf.mxu1 }
 0x177   :  { %v1464_v22 = vadd.f32 %v1399_v48, %v1278_v12  ;;  %v1465_v15 = vadd.f32 %v1419_v60, %v1279_v16 }
 0x17d   :  { %v1439_v11 = vpop.f32.mrf.mxu2 }
 0x17e   :  { %v1545_v61 = vpop.f32.mrf.mxu0  ;;  %v1466_v17 = vadd.f32 %v1439_v11, %v1280_v29 }
 0x17f   :  { %v1648_v63 = vadd.f32 %v1545_v61, %v1462_v58 }
 0x181   :  { %v1660_v5 = vadd.f32 %v1658_v59, %v1648_v63 }
 0x183   :  { %1666 = vrot.lane.b32.xlu0 %v1660_v5, %s1962_s25  ;;  %v1459_v0 = vpop.f32.mrf.mxu3 }
 0x184   :  { %v1467_v42 = vadd.f32 %v1459_v0, %v1281_v37 }
 0x186   :  { %v1565_v20 = vpop.f32.mrf.mxu1 }
 0x187   :  { %v1649_v23 = vadd.f32 %v1565_v20, %v1463_v10 }
 0x189   :  { %v1661_v1 = vadd.f32 %v1658_v59, %v1649_v23 }
 0x18b   :  { %1668 = vrot.lane.b32.xlu1 %v1661_v1, %s1962_s25 }
 0x18d   :  { %v1585_v31 = vpop.f32.mrf.mxu2  ;;  %v1605_v32 = vpop.f32.mrf.mxu3 }
 0x18e   :  { %v1650_v30 = vadd.f32 %v1585_v31, %v1464_v22  ;;  %v1651_v35 = vadd.f32 %v1605_v32, %v1465_v15  ;;  %v1625_v34 = vpop.f32.mrf.mxu0  ;;  %v1645_v28 = vpop.f32.mrf.mxu1 }
 0x18f   :  { %v1652_v36 = vadd.f32 %v1625_v34, %v1466_v17  ;;  %v1653_v33 = vadd.f32 %v1645_v28, %v1467_v42 }
 0x190   :  { %v1662_v38 = vadd.f32 %v1658_v59, %v1650_v30  ;;  %v1663_v40 = vadd.f32 %v1658_v59, %v1651_v35 }
 0x191   :  { %v1664_v24 = vadd.f32 %v1658_v59, %v1652_v36  ;;  %v1665_v41 = vadd.f32 %v1658_v59, %v1653_v33 }
 0x192   :  { %1670 = vrot.lane.b32.xlu2 %v1662_v38, %s1962_s25  ;;  %1672 = vrot.lane.b32.xlu0 %v1663_v40, %s1962_s25 }
 0x193   :  { %1674 = vrot.lane.b32.xlu1 %v1664_v24, %s1962_s25 }
 0x19a   :  { %1676 = vrot.lane.b32.xlu2 %v1665_v41, %s1962_s25 }
 0x1ec   :  { %v1671_v44 = vpop.permute.xlu2 %1670 }
 0x1f4   :  { %v1677_v53 = vpop.permute.xlu2 %1676 }
 0x1f5   :  { %v1667_v45 = vpop.permute.xlu0 %1666 }
 0x1f6   :  { %v1686_v62 = vsel %vm1680_vm10, %v1677_v53, %v1667_v45 }
 0x1f7   :  { %v1692_v63 = vmax.f32 %v1665_v41, %v1686_v62  ;;  %v1971_v62 = vmov 0  }
 0x1f8   :  { %1957 = vset.pattern.permute.xlu2 %v1971_v62 }
 0x1fd   :  { %v1669_v46 = vpop.permute.xlu1 %1668 }
 0x1fe   :  { %v1684_v47 = vsel %vm1680_vm10, %v1669_v46, %v1671_v44  ;;  %v1685_v48 = vsel %vm1680_vm10, %v1667_v45, %v1669_v46 }
 0x1ff   :  { %v1687_v49 = vmax.f32 %v1660_v5, %v1685_v48  ;;  %v1688_v51 = vmax.f32 %v1661_v1, %v1684_v47  ;;  %v1718_v5 = vld [vmem:[%s2405_s3] sm:$0x3f]  ;;  %s1972_s3 = smov 1  }
 0x200   :  { %v1721_v7 = vperm.slane %v1718_v5, 1  ;;  %v1720_v8 = vperm.slane %v1718_v5, 0  ;;  %v1722_v21 = vperm.slane %v1718_v5, 2  ;;  %v1723_v1 = vperm.slane %v1718_v5, 3 }
 0x201   :  { %1695 = vrot.lane.b32.xlu1 %v1688_v51, %s1964_s5  ;;  %1693 = vrot.lane.b32.xlu0 %v1687_v49, %s1964_s5  ;;  %v1724_v15 = vperm.slane %v1718_v5, 4  ;;  %v1725_v32 = vperm.slane %v1718_v5, 5 }
 0x204   :  { %v1673_v52 = vpop.permute.xlu0 %1672 }
 0x205   :  { %v1683_v54 = vsel %vm1680_vm10, %v1671_v44, %v1673_v52  ;;  %v1675_v55 = vpop.permute.xlu1 %1674 }
 0x206   :  { %v1689_v56 = vmax.f32 %v1662_v38, %v1683_v54  ;;  %v1681_v58 = vsel %vm1680_vm10, %v1675_v55, %v1677_v53  ;;  %v1682_v59 = vsel %vm1680_vm10, %v1673_v52, %v1675_v55 }
 0x207   :  { %v1690_v60 = vmax.f32 %v1663_v40, %v1682_v59  ;;  %v1691_v61 = vmax.f32 %v1664_v24, %v1681_v58 }
 0x208   :  { %1697 = vrot.lane.b32.xlu2 %v1689_v56, %s1964_s5 }
 0x209   :  { %1701 = vrot.lane.b32.xlu1 %v1691_v61, %s1964_s5  ;;  %1699 = vrot.lane.b32.xlu0 %v1690_v60, %s1964_s5 }
 0x210   :  { %1703 = vrot.lane.b32.xlu2 %v1692_v63, %s1964_s5 }
 0x262   :  { %v1698_v50 = vpop.permute.xlu2 %1697 }
 0x26a   :  { %v1704_v11 = vpop.permute.xlu2 %1703 }
 0x273   :  { %v1696_v3 = vpop.permute.xlu1 %1695  ;;  %v1694_v4 = vpop.permute.xlu0 %1693 }
 0x274   :  { %v1709_v2 = vsel %vm1705_vm11, %v1696_v3, %v1698_v50  ;;  %v1710_v0 = vsel %vm1705_vm11, %v1694_v4, %v1696_v3  ;;  %v1711_v16 = vsel %vm1705_vm11, %v1704_v11, %v1694_v4 }
 0x275   :  { %v2348_v9 = vmax.f32 %v1688_v51, %v1709_v2  ;;  %v2350_v10 = vmax.f32 %v1687_v49, %v1710_v0  ;;  %v2365_v17 = vmax.f32 %v1692_v63, %v1711_v16 }
 0x277   :  { %v1733_v18 = vmul.f32 %v1721_v7, %v2348_v9  ;;  %v1732_v19 = vmul.f32 %v1720_v8, %v2350_v10  ;;  %v1737_v34 = vmul.f32 %v1725_v32, %v2365_v17 }
 0x279   :  { %v1738_v29 = vadd.f32 %v1733_v18, %v1732_v19 }
 0x27b   :  { %v1702_v20 = vpop.permute.xlu1 %1701  ;;  %v1700_v23 = vpop.permute.xlu0 %1699 }
 0x27c   :  { %v1706_v14 = vsel %vm1705_vm11, %v1702_v20, %v1704_v11  ;;  %v1707_v27 = vsel %vm1705_vm11, %v1700_v23, %v1702_v20  ;;  %v1708_v6 = vsel %vm1705_vm11, %v1698_v50, %v1700_v23  ;;  %v1973_v20 = vmov 1  }
 0x27d   :  { %v2357_v25 = vmax.f32 %v1689_v56, %v1708_v6  ;;  %v2359_v12 = vmax.f32 %v1690_v60, %v1707_v27  ;;  %v2362_v26 = vmax.f32 %v1691_v61, %v1706_v14  ;;  %1959 = vset.pattern.permute.xlu0 %v1973_v20 }
 0x27f   :  { %v1734_v22 = vmul.f32 %v1722_v21, %v2357_v25  ;;  %v1735_v31 = vmul.f32 %v1723_v1, %v2359_v12  ;;  %v1736_v30 = vmul.f32 %v1724_v15, %v2362_v26 }
 0x281   :  { %v1739_v13 = vadd.f32 %v1738_v29, %v1734_v22 }
 0x283   :  { %v1740_v35 = vadd.f32 %v1739_v13, %v1735_v31 }
 0x285   :  { %v1741_v36 = vadd.f32 %v1740_v35, %v1736_v30 }
 0x287   :  { %v1742_v37 = vadd.f32 %v1741_v36, %v1737_v34 }
 0x289   :  { %1743 = vadd.xlane.f32.xlu0 %v1742_v37 }
 0x2fc   :  { %v1744_v38 = vpop.xlane.xlu0 %1743 }
 0x2fd   :  { %v1745_v40 = vmul.f32 0.0078125, %v1744_v38 }
 0x2ff   :  { %v1746_v24 = vsub.f32 %v2350_v10, %v1745_v40  ;;  %v1747_v28 = vsub.f32 %v2348_v9, %v1745_v40  ;;  %v1748_v42 = vsub.f32 %v2357_v25, %v1745_v40  ;;  %v1749_v33 = vsub.f32 %v2359_v12, %v1745_v40 }
 0x300   :  { %v1750_v41 = vsub.f32 %v2362_v26, %v1745_v40  ;;  %v1751_v45 = vsub.f32 %v2365_v17, %v1745_v40 }
 0x301   :  { %v1752_v39 = vmul.f32 %v1746_v24, %v1720_v8  ;;  %v1753_v43 = vmul.f32 %v1747_v28, %v1721_v7  ;;  %v1754_v44 = vmul.f32 %v1748_v42, %v1722_v21  ;;  %v1755_v46 = vmul.f32 %v1749_v33, %v1723_v1 }
 0x302   :  { %v1756_v49 = vmul.f32 %v1750_v41, %v1724_v15  ;;  %v1757_v53 = vmul.f32 %v1751_v45, %v1725_v32 }
 0x303   :  { %v1758_v47 = vmul.f32 %v1752_v39, %v1752_v39  ;;  %v1759_v48 = vmul.f32 %v1753_v43, %v1753_v43  ;;  %v1760_v51 = vmul.f32 %v1754_v44, %v1754_v44  ;;  %v1761_v54 = vmul.f32 %v1755_v46, %v1755_v46 }
 0x304   :  { %v1762_v56 = vmul.f32 %v1756_v49, %v1756_v49  ;;  %v1763_v59 = vmul.f32 %v1757_v53, %v1757_v53 }
 0x305   :  { %v1764_v52 = vadd.f32 %v1759_v48, %v1758_v47 }
 0x307   :  { %v1765_v55 = vadd.f32 %v1764_v52, %v1760_v51 }
 0x309   :  { %v1766_v58 = vadd.f32 %v1765_v55, %v1761_v54 }
 0x30b   :  { %v1767_v60 = vadd.f32 %v1766_v58, %v1762_v56 }
 0x30d   :  { %v1768_v61 = vadd.f32 %v1767_v60, %v1763_v59 }
 0x30f   :  { %1769 = vadd.xlane.f32.xlu1 %v1768_v61 }
 0x382   :  { %v1770_v63 = vpop.xlane.xlu1 %1769 }
 0x383   :  { %v1771_v50 = vmul.f32 0.0078125, %v1770_v63 }
 0x385   :  { %v1772_v3 = vadd.f32 1e-05, %v1771_v50 }
 0x387   :  { %1960 = vrsqrt.f32 %v1772_v3  ;;  %vm1779_vm13 = vweird.f32 %v1772_v3 }
 0x38d   :  { %v1961_v4 = vpop.eup %1960 }
 0x38e   :  { %v1774_v5 = vmul.f32 %v1961_v4, %v1772_v3  ;;  %vm1780_vm12 = vweird.f32 %v1961_v4 }
 0x38f   :  { %vm1781_vm14 = vmor %vm1779_vm13, %vm1780_vm12 }
 0x390   :  { %v1775_v2 = vmul.f32 %v1961_v4, %v1774_v5 }
 0x392   :  { %v1776_v0 = vmul.f32 0.5, %v1775_v2 }
 0x394   :  { %v1777_v7 = vsub.f32 1.5, %v1776_v0 }
 0x396   :  { %v1778_v8 = vmul.f32 %v1961_v4, %v1777_v7 }
 0x398   :  { %v1782_v11 = vsel %vm1781_vm14, %v1961_v4, %v1778_v8 }
 0x399   :  { %v1783_v18 = vmul.f32 %v1782_v11, %v2308_v57 }
 0x39b   :  { %v1784_v19 = vmul.f32 %v1783_v18, %v1745_v40 }
 0x39d   :  { %1786 = vrot.lane.b32.xlu2 %v1784_v19, %s1972_s3 }
 0x3a5   :  { %1792 = vperm.xlu2 %1957, %v1783_v18  }
 0x3ad   :  { %1958 = vset.pattern.permute.xlu2 %v1973_v20 }
 0x3f7   :  { %v1787_v21 = vpop.permute.xlu2 %1786 }
 0x3f8   :  { %v1789_v23 = vsub.f32 %v2308_v57, %v1787_v21 }
 0x3fa   :  { %1803 = vperm.xlu2 %1958, %v1789_v23  }
 0x3ff   :  { %v1793_v14 = vpop.permute.xlu2 %1792 }
 0x400   :  { %v1795_v27 = vmul.f32 %v1793_v14, %v2350_v10  ;;  %v1796_v6 = vmul.f32 %v1793_v14, %v2348_v9  ;;  %v1797_v1 = vmul.f32 %v1793_v14, %v2357_v25  ;;  %v1798_v16 = vmul.f32 %v1793_v14, %v2359_v12 }
 0x401   :  { %v1799_v29 = vmul.f32 %v1793_v14, %v2362_v26  ;;  %v1800_v22 = vmul.f32 %v1793_v14, %v2365_v17 }
 0x454   :  { %v1804_v15 = vpop.permute.xlu2 %1803 }
 0x455   :  { %v1806_v31 = vadd.f32 %v1804_v15, %v1795_v27  ;;  %v1807_v32 = vadd.f32 %v1804_v15, %v1796_v6  ;;  %v1808_v13 = vadd.f32 %v1804_v15, %v1797_v1  ;;  %v1809_v30 = vadd.f32 %v1804_v15, %v1798_v16 }
 0x456   :  { %v1810_v57 = vadd.f32 %v1804_v15, %v1799_v29  ;;  %v1811_v35 = vadd.f32 %v1804_v15, %v1800_v22 }
 0x457   :  { %v1812_v34 = vmax.f32 %v1806_v31, 0.0  ;;  %v1813_v36 = vmax.f32 %v1807_v32, 0.0  ;;  %v1814_v10 = vmax.f32 %v1808_v13, 0.0  ;;  %v1815_v37 = vmax.f32 %v1809_v30, 0.0 }
 0x458   :  { %v1816_v9 = vmax.f32 %v1810_v57, 0.0  ;;  %v1817_v25 = vmax.f32 %v1811_v35, 0.0 }
 0x459   :  { %1818 = vst [vmem:[%s2406_s4] sm:$0xff] %v1812_v34 }
 0x45a   :  { %1819 = vst [vmem:[%s2406_s4 + $0x8] sm:$0xff] %v1813_v36 }
 0x45b   :  { %1820 = vst [vmem:[%s2406_s4 + $0x10] sm:$0xff] %v1814_v10 }
 0x45c   :  { %1821 = vst [vmem:[%s2406_s4 + $0x18] sm:$0xff] %v1815_v37 }
 0x45d   :  { %1822 = vst [vmem:[%s2406_s4 + $0x20] sm:$0xff] %v1816_v9 }
 0x45e   :  { %1823 = vst [vmem:[%s2406_s4 + $0x28] sm:$0xff] %v1817_v25 }

</bundles_post_ra>
